<compile_context>
chip_gen: v6e
topology: v6e:2x2x1
jax: 0.10.0
libtpu: 0.0.40
codegen_flags: <defaults>
</compile_context>

<pallas_src>
import jax
import jax.numpy as jnp
from jax.experimental import pallas as pl
from jax.experimental.pallas import tpu as pltpu

EPS = 1e-5          # torch.nn.LayerNorm default
LANE = 128
SUBLANE = 8


def _round_up(x, m):
    return ((x + m - 1) // m) * m


# ----------------------------- in-kernel helpers -----------------------------

def _layernorm(h, d_real, gamma=None, beta=None):
    """PyTorch LayerNorm (biased variance) over the last dim.

    Only the first `d_real` lanes of `h` hold real data and the padded lanes are
    guaranteed to be exactly zero, so mu = sum(h)/d_real and E[x^2] = sum(h*h)/d_real
    are exact WITHOUT a lane mask (no iota/compare/select pass per call).
    """
    inv_d = 1.0 / float(d_real)
    mu = jnp.sum(h, axis=-1, keepdims=True) * inv_d
    ex2 = jnp.sum(h * h, axis=-1, keepdims=True) * inv_d
    var = jnp.maximum(ex2 - mu * mu, 0.0)
    y = (h - mu) * jax.lax.rsqrt(var + EPS)
    if gamma is not None:
        y = y * gamma + beta          # gamma/beta are zero in padded lanes
    return y


# ------------------------------ fused kernel ----------------------------------

def make_fused_kernel(plan, nonlinear):
    """Single kernel implementing all layers described by `plan`.

    Ref order: x_ref, vec_pack_ref, <one ref per stacked-weight group>, o_ref.
    """

    def kernel(*refs):
        x_ref, vec_ref = refs[0], refs[1]
        w_refs = refs[2:-1]
        o_ref = refs[-1]
        vec_width = vec_ref.shape[-1]

        def W(wid):                               # (group, slot) -> [K, N] weight
            g, s = wid
            return w_refs[g][s]

        def V(row, d_pad):                        # packed-vector row -> (1, d_pad)
            v = vec_ref[pl.ds(row, 1), :]
            return v if d_pad == vec_width else v[:, :d_pad]

        def mm(a, wid):                           # MXU matmul, f32 accumulation
            w = W(wid)
            return jnp.dot(a.astype(w.dtype), w, preferred_element_type=jnp.float32)

        h = x_ref[...].astype(jnp.float32)
        for L in plan:
            if L["kind"] == "linear":
                h = mm(h, L["w"]) + V(L["b"], L["dout_pad"])
                continue

            d_real, d_pad = L["dout"], L["dout_pad"]
            if L["has_ds"]:
                # fc1 and downsample share the LHS -> one fused 2*d_pad-wide GEMM.
                hh = mm(h, L["w1"])
                h1 = hh[:, :d_pad] + V(L["b1"], d_pad)
                hd = hh[:, d_pad:] + V(L["bd"], d_pad)
                ident = _layernorm(hd, d_real, V(L["gd"], d_pad), V(L["bed"], d_pad))
            else:
                h1 = mm(h, L["w1"]) + V(L["b1"], d_pad)
                ident = h

            if L["fold_ln1"]:
                y = _layernorm(h1, d_real)        # LN1 affine folded into w2/b2
            else:
                y = _layernorm(h1, d_real, V(L["g1"], d_pad), V(L["be1"], d_pad))
                if nonlinear:
                    y = jnp.maximum(y, 0.0)

            y = mm(y, L["w2"]) + V(L["b2"], d_pad)
            y = _layernorm(y, d_real, V(L["g2"], d_pad), V(L["be2"], d_pad))
            y = y + ident
            if nonlinear:
                y = jnp.maximum(y, 0.0)
            h = y

        o_ref[...] = h.astype(o_ref.dtype)

    return kernel


# ------------------ one-time parameter preparation (init time) ----------------

def _pad_w(w, k_pad, n_pad):
    """[out, in] torch weight -> transposed, zero-padded [k_pad, n_pad] (f32)."""
    wt = jnp.asarray(w, jnp.float32).T
    k, n = wt.shape
    return jnp.pad(wt, ((0, k_pad - k), (0, n_pad - n)))


def _pad_v(v, n_pad):
    v = jnp.asarray(v, jnp.float32)
    return jnp.pad(v, (0, n_pad - v.shape[0]))


def prepare_fused(params, weights_dtype=jnp.float32):
    """Transpose / pad / concat / fold / pack all parameters ONCE.

    Returns (plan, flat_params) where flat_params = [vec_pack, *weight_stacks].
    """
    nonlinear = params["nonlinear"]
    weight_arrays, vec_rows, plan = [], [], []

    def add_w(a):
        weight_arrays.append(a.astype(weights_dtype))
        return len(weight_arrays) - 1

    def add_v(v):
        vec_rows.append(v)
        return len(vec_rows) - 1

    # Width of the activations entering the current layer. The raw input x keeps its
    # real feature dim (no wrapper-side padding); every later activation is padded to
    # a multiple of 128 lanes by construction.
    in_pad = params["layers"][0][1]["w"].shape[1]

    for kind, p in params["layers"]:
        if kind == "linear":
            dout = p["w"].shape[0]
            dout_pad = _round_up(dout, LANE)
            plan.append(dict(kind="linear", dout=dout, dout_pad=dout_pad,
                             w=add_w(_pad_w(p["w"], in_pad, dout_pad)),
                             b=add_v(_pad_v(p["b"], dout_pad))))
            in_pad = dout_pad
            continue

        dout = p["w1"].shape[0]
        dout_pad = _round_up(dout, LANE)
        has_ds = "wd" in p
        fold = not nonlinear        # LN1 affine commutes with fc2 only without ReLU

        w1 = _pad_w(p["w1"], in_pad, dout_pad)
        if has_ds:
            w1 = jnp.concatenate([w1, _pad_w(p["wd"], in_pad, dout_pad)], axis=1)

        entry = dict(kind="resblock", dout=dout, dout_pad=dout_pad,
                     has_ds=has_ds, fold_ln1=fold,
                     w1=add_w(w1), b1=add_v(_pad_v(p["b1"], dout_pad)))
        if has_ds:
            entry["bd"] = add_v(_pad_v(p["bd"], dout_pad))
            entry["gd"] = add_v(_pad_v(p["gd"], dout_pad))
            entry["bed"] = add_v(_pad_v(p["bed"], dout_pad))

        w2 = _pad_w(p["w2"], dout_pad, dout_pad)
        b2 = _pad_v(p["b2"], dout_pad)
        if fold:
            # (LN(x)*g1 + be1) @ W2 + b2  ==  LN(x) @ (diag(g1) W2) + (be1 @ W2 + b2)
            g1 = _pad_v(p["g1"], dout_pad)
            be1 = _pad_v(p["be1"], dout_pad)
            b2 = be1 @ w2 + b2
            w2 = w2 * g1[:, None]
        else:
            entry["g1"] = add_v(_pad_v(p["g1"], dout_pad))
            entry["be1"] = add_v(_pad_v(p["be1"], dout_pad))
        entry["w2"] = add_w(w2)
        entry["b2"] = add_v(b2)
        entry["g2"] = add_v(_pad_v(p["g2"], dout_pad))
        entry["be2"] = add_v(_pad_v(p["be2"], dout_pad))
        plan.append(entry)
        in_pad = dout_pad

    # ---- pack every 1-D param into ONE [n_vec, vec_width] f32 array -------------
    vec_width = max(v.shape[0] for v in vec_rows)
    vec_pack = jnp.stack([jnp.pad(v, (0, vec_width - v.shape[0])) for v in vec_rows])

    # ---- group equally-shaped weight matrices into stacked [L, K, N] arrays -----
    groups = {}
    for gi, w in enumerate(weight_arrays):
        groups.setdefault(tuple(w.shape), []).append(gi)
    w_stacks, w_map = [], {}
    for gno, (_, idxs) in enumerate(groups.items()):
        w_stacks.append(jnp.stack([weight_arrays[i] for i in idxs], axis=0))
        for slot, gi in enumerate(idxs):
            w_map[gi] = (gno, slot)
    for L in plan:
        for key in ("w", "w1", "w2"):
            if key in L:
                L[key] = w_map[L[key]]

    return plan, [vec_pack] + w_stacks


# ------------------------------ fused forward ----------------------------------

def make_forward(plan, nonlinear, output_dim, tile_b=1024):
    """forward(flat_params, x) -> [B, output_dim] via a single pallas_call."""
    out_pad = plan[-1]["dout_pad"]
    n_ln = sum(2 + (1 if L["has_ds"] else 0)
               for L in plan if L["kind"] == "resblock")
    kernel = make_fused_kernel(plan, nonlinear)

    def forward(flat_params, x):
        B, din = x.shape
        vec_pack, w_stacks = flat_params[0], flat_params[1:]

        # >= 2 batch tiles so "parallel" actually shards across both TensorCores on
        # v7x; otherwise keep tiles as large as possible (few grid steps) for the
        # single-TC v5e/v6e.  x's feature dim is NOT padded.
        tb = min(tile_b, max(_round_up(pl.cdiv(B, 2), SUBLANE), SUBLANE))
        n_tiles = max(2, pl.cdiv(B, tb))
        b_pad = n_tiles * tb
        x_p = x if b_pad == B else jnp.pad(x, ((0, b_pad - B), (0, 0)))

        in_specs = [pl.BlockSpec((tb, din), lambda i: (i, 0)),
                    pl.BlockSpec(vec_pack.shape, lambda i: (0, 0))]
        # Weight stacks: full-array blocks, constant index_map -> resident in VMEM.
        in_specs += [pl.BlockSpec(w.shape, lambda i: (0, 0, 0)) for w in w_stacks]
        out_spec = pl.BlockSpec((tb, out_pad), lambda i: (i, 0))

        mm_flops = 2 * b_pad * sum(int(w.shape[0]) * int(w.shape[1]) * int(w.shape[2])
                                   for w in w_stacks)
        bytes_acc = (x_p.size * x_p.dtype.itemsize
                     + sum(int(w.size) * w.dtype.itemsize for w in flat_params)
                     + b_pad * out_pad * 4)

        out = pl.pallas_call(
            kernel,
            out_shape=jax.ShapeDtypeStruct((b_pad, out_pad), jnp.float32),
            grid=(n_tiles,),
            in_specs=in_specs,
            out_specs=out_spec,
            compiler_params=pltpu.CompilerParams(
                dimension_semantics=("parallel",)),
            cost_estimate=pl.CostEstimate(
                flops=mm_flops,
                transcendentals=b_pad * n_ln,
                bytes_accessed=bytes_acc),
        )(x_p, *flat_params)
        return out[:B, :output_dim]

    return forward


# ----------------------------- parameter creation -----------------------------

def _init_linear(key, in_dim, out_dim):
    # Mimics PyTorch nn.Linear default init.
    kw, kb = jax.random.split(key)
    bound = 1.0 / jnp.sqrt(in_dim)
    w = jax.random.uniform(kw, (out_dim, in_dim), jnp.float32, -bound, bound)
    b = jax.random.uniform(kb, (out_dim,), jnp.float32, -bound, bound)
    return w, b


def _init_layernorm(key, dim):
    # Torch default is ones/zeros; randomize so the affine / LN1-folding logic is
    # genuinely exercised by the correctness check (semantics are identical).
    kg, kb = jax.random.split(key)
    g = jax.random.uniform(kg, (dim,), jnp.float32, 0.5, 1.5)
    b = jax.random.uniform(kb, (dim,), jnp.float32, -0.5, 0.5)
    return g, b


def init_linear_resnet(key, input_dim, output_dim, layers, nonlinear=False):
    """Builds params for LinearResNetNN(block='Basic')."""
    n_keys = 2 + 6 * max(len(layers) - 1, 0)
    keys = iter(jax.random.split(key, n_keys))
    params = {"layers": [], "nonlinear": nonlinear}

    w, b = _init_linear(next(keys), input_dim, layers[0])
    params["layers"].append(("linear", {"w": w, "b": b}))

    for i in range(len(layers) - 1):
        din, dout = layers[i], layers[i + 1]
        blk = {}
        blk["w1"], blk["b1"] = _init_linear(next(keys), din, dout)
        blk["g1"], blk["be1"] = _init_layernorm(next(keys), dout)
        blk["w2"], blk["b2"] = _init_linear(next(keys), dout, dout)
        blk["g2"], blk["be2"] = _init_layernorm(next(keys), dout)
        kd, kdl = next(keys), next(keys)
        if din != dout:
            blk["wd"], blk["bd"] = _init_linear(kd, din, dout)
            blk["gd"], blk["bed"] = _init_layernorm(kdl, dout)
        params["layers"].append(("resblock", blk))

    w, b = _init_linear(next(keys), layers[-1], output_dim)
    params["layers"].append(("linear", {"w": w, "b": b}))
    return params


# ------------------------- pure-JAX reference (check) --------------------------

def _ref_layernorm(x, g, b):
    mu = jnp.mean(x, axis=-1, keepdims=True)
    var = jnp.mean((x - mu) ** 2, axis=-1, keepdims=True)
    return (x - mu) * jax.lax.rsqrt(var + EPS) * g + b


def reference_forward(params, x):
    h = x
    nl = params["nonlinear"]
    for kind, p in params["layers"]:
        if kind == "linear":
            h = h @ p["w"].T + p["b"]
        else:
            ident = h
            y = _ref_layernorm(h @ p["w1"].T + p["b1"], p["g1"], p["be1"])
            if nl:
                y = jnp.maximum(y, 0.0)
            y = _ref_layernorm(y @ p["w2"].T + p["b2"], p["g2"], p["be2"])
            if "wd" in p:
                ident = _ref_layernorm(ident @ p["wd"].T + p["bd"], p["gd"], p["bed"])
            y = y + ident
            if nl:
                y = jnp.maximum(y, 0.0)
            h = y
    return h


# ----------------------------------- main --------------------------------------

if __name__ == "__main__":
    key = jax.random.PRNGKey(0)
    k_param, k_x = jax.random.split(key)

    # LinearResNetNN(input_dim=32, output_dim=16, layers=[64, 48, 48], block='Basic')
    input_dim, output_dim = 32, 16
    hidden = [64, 48, 48]       # ResidualBlock(64,48) has a downsample; RB(48,48) not
    batch = 8

    x = jax.random.normal(k_x, (batch, input_dim), jnp.float32)

    # ---- config A: nonlinear=False (LN1 affine folded into fc2) ----------------
    params = init_linear_resnet(k_param, input_dim, output_dim, hidden,
                                nonlinear=False)
    ref = reference_forward(params, x)

    plan32, flat32 = prepare_fused(params, weights_dtype=jnp.float32)
    fwd32 = jax.jit(make_forward(plan32, False, output_dim))
    out32 = jax.block_until_ready(fwd32(flat32, x))
    assert out32.shape == (batch, output_dim)
    assert jnp.allclose(out32, ref, atol=1e-4, rtol=1e-4), "f32 mismatch vs reference"

    # bf16 weights + bf16 matmul LHS (f32 MXU accumulation, f32 LayerNorm math).
    plan16, flat16 = prepare_fused(params, weights_dtype=jnp.bfloat16)
    fwd16 = jax.jit(make_forward(plan16, False, output_dim))
    out16 = jax.block_until_ready(fwd16(flat16, x))
    assert jnp.allclose(out16, ref, atol=1e-1, rtol=1e-1), "bf16 mismatch vs reference"

    # ---- config B: nonlinear=True (ReLU path, LN1 affine kept in-kernel) -------
    params_nl = init_linear_resnet(k_param, input_dim, output_dim, hidden,
                                   nonlinear=True)
    ref_nl = reference_forward(params_nl, x)
    plan_nl, flat_nl = prepare_fused(params_nl, weights_dtype=jnp.float32)
    fwd_nl = jax.jit(make_forward(plan_nl, True, output_dim))
    out_nl = jax.block_until_ready(fwd_nl(flat_nl, x))
    assert jnp.allclose(out_nl, ref_nl, atol=1e-4, rtol=1e-4), "nonlinear mismatch"

    print("KERNEL_OK")
</pallas_src>

<mosaic_0001>
module attributes {stable_mosaic.version = 11 : i64} {
  func.func @kernel(%arg0: i32, %arg1: memref<8x32xf32, #tpu.memory_space<vmem>>, %arg2: memref<13x128xf32, #tpu.memory_space<vmem>>, %arg3: memref<1x32x128xf32, #tpu.memory_space<vmem>>, %arg4: memref<1x128x256xf32, #tpu.memory_space<vmem>>, %arg5: memref<4x128x128xf32, #tpu.memory_space<vmem>>, %arg6: memref<8x128xf32, #tpu.memory_space<vmem>>) attributes {dimension_semantics = [#tpu.dimension_semantics<parallel>], iteration_bounds = array<i64: 2>, scalar_prefetch = 0 : i64, scratch_operands = 0 : i64, tpu.core_type = #tpu.core_type<tc>, window_params = [{transform_indices = @transform_0, window_bounds = array<i64: 8, 32>}, {pipeline_mode = #tpu.pipeline_mode<synchronous>, transform_indices = @transform_1, window_bounds = array<i64: 13, 128>}, {pipeline_mode = #tpu.pipeline_mode<synchronous>, transform_indices = @transform_2, window_bounds = array<i64: 1, 32, 128>}, {pipeline_mode = #tpu.pipeline_mode<synchronous>, transform_indices = @transform_3, window_bounds = array<i64: 1, 128, 256>}, {pipeline_mode = #tpu.pipeline_mode<synchronous>, transform_indices = @transform_4, window_bounds = array<i64: 4, 128, 128>}, {transform_indices = @transform_5, window_bounds = array<i64: 8, 128>}]} {
    %c0 = arith.constant 0 : index
    %c0_0 = arith.constant 0 : index
    %0 = vector.load %arg1[%c0, %c0_0] : memref<8x32xf32, #tpu.memory_space<vmem>>, vector<8x32xf32>
    %c0_1 = arith.constant 0 : index
    %c0_2 = arith.constant 0 : index
    %c0_3 = arith.constant 0 : index
    %1 = vector.load %arg3[%c0_1, %c0_2, %c0_3] : memref<1x32x128xf32, #tpu.memory_space<vmem>>, vector<1x32x128xf32>
    %2 = vector.shape_cast %1 : vector<1x32x128xf32> to vector<32x128xf32>
    %cst = arith.constant dense<0.000000e+00> : vector<8x128xf32>
    %3 = tpu.matmul %0, %2, %cst {dimension_numbers = #tpu.dot_dimension_numbers<[1], [0], [0], [1], [0, 0, 1, 1], [], []>} : vector<8x32xf32>, vector<32x128xf32>, vector<8x128xf32> -> vector<8x128xf32>
    %c0_4 = arith.constant 0 : index
    %c0_5 = arith.constant 0 : index
    %4 = vector.load %arg2[%c0_4, %c0_5] : memref<13x128xf32, #tpu.memory_space<vmem>>, vector<1x128xf32>
    %5 = vector.broadcast %4 : vector<1x128xf32> to vector<8x128xf32>
    %6 = arith.addf %3, %5 : vector<8x128xf32>
    %c0_6 = arith.constant 0 : index
    %c0_7 = arith.constant 0 : index
    %c0_8 = arith.constant 0 : index
    %7 = vector.load %arg4[%c0_6, %c0_7, %c0_8] : memref<1x128x256xf32, #tpu.memory_space<vmem>>, vector<1x128x256xf32>
    %8 = vector.shape_cast %7 : vector<1x128x256xf32> to vector<128x256xf32>
    %cst_9 = arith.constant dense<0.000000e+00> : vector<8x256xf32>
    %9 = tpu.matmul %6, %8, %cst_9 {dimension_numbers = #tpu.dot_dimension_numbers<[1], [0], [0], [1], [0, 0, 1, 1], [], []>} : vector<8x128xf32>, vector<128x256xf32>, vector<8x256xf32> -> vector<8x256xf32>
    %10 = vector.extract_strided_slice %9 {offsets = [0, 0], sizes = [8, 128], strides = [1, 1]} : vector<8x256xf32> to vector<8x128xf32>
    %c1 = arith.constant 1 : index
    %c0_10 = arith.constant 0 : index
    %11 = vector.load %arg2[%c1, %c0_10] : memref<13x128xf32, #tpu.memory_space<vmem>>, vector<1x128xf32>
    %12 = vector.broadcast %11 : vector<1x128xf32> to vector<8x128xf32>
    %13 = arith.addf %10, %12 : vector<8x128xf32>
    %14 = vector.extract_strided_slice %9 {offsets = [0, 128], sizes = [8, 128], strides = [1, 1]} : vector<8x256xf32> to vector<8x128xf32>
    %c2 = arith.constant 2 : index
    %c0_11 = arith.constant 0 : index
    %15 = vector.load %arg2[%c2, %c0_11] : memref<13x128xf32, #tpu.memory_space<vmem>>, vector<1x128xf32>
    %16 = vector.broadcast %15 : vector<1x128xf32> to vector<8x128xf32>
    %17 = arith.addf %14, %16 : vector<8x128xf32>
    %c3 = arith.constant 3 : index
    %c0_12 = arith.constant 0 : index
    %18 = vector.load %arg2[%c3, %c0_12] : memref<13x128xf32, #tpu.memory_space<vmem>>, vector<1x128xf32>
    %c4 = arith.constant 4 : index
    %c0_13 = arith.constant 0 : index
    %19 = vector.load %arg2[%c4, %c0_13] : memref<13x128xf32, #tpu.memory_space<vmem>>, vector<1x128xf32>
    %cst_14 = arith.constant dense<0.000000e+00> : vector<8xf32>
    %20 = vector.multi_reduction <add>, %17, %cst_14 [1] : vector<8x128xf32> to vector<8xf32>
    %21 = vector.shape_cast %20 : vector<8xf32> to vector<8x1xf32>
    %cst_15 = arith.constant 0.020833334 : f32
    %22 = vector.broadcast %cst_15 : f32 to vector<8x1xf32>
    %23 = arith.mulf %21, %22 : vector<8x1xf32>
    %24 = arith.mulf %17, %17 : vector<8x128xf32>
    %cst_16 = arith.constant dense<0.000000e+00> : vector<8xf32>
    %25 = vector.multi_reduction <add>, %24, %cst_16 [1] : vector<8x128xf32> to vector<8xf32>
    %26 = vector.shape_cast %25 : vector<8xf32> to vector<8x1xf32>
    %cst_17 = arith.constant 0.020833334 : f32
    %27 = vector.broadcast %cst_17 : f32 to vector<8x1xf32>
    %28 = arith.mulf %26, %27 : vector<8x1xf32>
    %29 = arith.mulf %23, %23 : vector<8x1xf32>
    %30 = arith.subf %28, %29 : vector<8x1xf32>
    %cst_18 = arith.constant 0.000000e+00 : f32
    %31 = vector.broadcast %cst_18 : f32 to vector<8x1xf32>
    %32 = arith.maximumf %30, %31 : vector<8x1xf32>
    %33 = vector.broadcast %23 : vector<8x1xf32> to vector<8x128xf32>
    %34 = arith.subf %17, %33 : vector<8x128xf32>
    %cst_19 = arith.constant 9.99999974E-6 : f32
    %35 = vector.broadcast %cst_19 : f32 to vector<8x1xf32>
    %36 = arith.addf %32, %35 : vector<8x1xf32>
    %37 = math.rsqrt %36 : vector<8x1xf32>
    %38 = vector.broadcast %37 : vector<8x1xf32> to vector<8x128xf32>
    %39 = arith.mulf %34, %38 : vector<8x128xf32>
    %40 = vector.broadcast %18 : vector<1x128xf32> to vector<8x128xf32>
    %41 = arith.mulf %39, %40 : vector<8x128xf32>
    %42 = vector.broadcast %19 : vector<1x128xf32> to vector<8x128xf32>
    %43 = arith.addf %41, %42 : vector<8x128xf32>
    %cst_20 = arith.constant dense<0.000000e+00> : vector<8xf32>
    %44 = vector.multi_reduction <add>, %13, %cst_20 [1] : vector<8x128xf32> to vector<8xf32>
    %45 = vector.shape_cast %44 : vector<8xf32> to vector<8x1xf32>
    %cst_21 = arith.constant 0.020833334 : f32
    %46 = vector.broadcast %cst_21 : f32 to vector<8x1xf32>
    %47 = arith.mulf %45, %46 : vector<8x1xf32>
    %48 = arith.mulf %13, %13 : vector<8x128xf32>
    %cst_22 = arith.constant dense<0.000000e+00> : vector<8xf32>
    %49 = vector.multi_reduction <add>, %48, %cst_22 [1] : vector<8x128xf32> to vector<8xf32>
    %50 = vector.shape_cast %49 : vector<8xf32> to vector<8x1xf32>
    %cst_23 = arith.constant 0.020833334 : f32
    %51 = vector.broadcast %cst_23 : f32 to vector<8x1xf32>
    %52 = arith.mulf %50, %51 : vector<8x1xf32>
    %53 = arith.mulf %47, %47 : vector<8x1xf32>
    %54 = arith.subf %52, %53 : vector<8x1xf32>
    %cst_24 = arith.constant 0.000000e+00 : f32
    %55 = vector.broadcast %cst_24 : f32 to vector<8x1xf32>
    %56 = arith.maximumf %54, %55 : vector<8x1xf32>
    %57 = vector.broadcast %47 : vector<8x1xf32> to vector<8x128xf32>
    %58 = arith.subf %13, %57 : vector<8x128xf32>
    %cst_25 = arith.constant 9.99999974E-6 : f32
    %59 = vector.broadcast %cst_25 : f32 to vector<8x1xf32>
    %60 = arith.addf %56, %59 : vector<8x1xf32>
    %61 = math.rsqrt %60 : vector<8x1xf32>
    %62 = vector.broadcast %61 : vector<8x1xf32> to vector<8x128xf32>
    %63 = arith.mulf %58, %62 : vector<8x128xf32>
    %c0_26 = arith.constant 0 : index
    %c0_27 = arith.constant 0 : index
    %c0_28 = arith.constant 0 : index
    %64 = vector.load %arg5[%c0_26, %c0_27, %c0_28] : memref<4x128x128xf32, #tpu.memory_space<vmem>>, vector<1x128x128xf32>
    %65 = vector.shape_cast %64 : vector<1x128x128xf32> to vector<128x128xf32>
    %cst_29 = arith.constant dense<0.000000e+00> : vector<8x128xf32>
    %66 = tpu.matmul %63, %65, %cst_29 {dimension_numbers = #tpu.dot_dimension_numbers<[1], [0], [0], [1], [0, 0, 1, 1], [], []>} : vector<8x128xf32>, vector<128x128xf32>, vector<8x128xf32> -> vector<8x128xf32>
    %c5 = arith.constant 5 : index
    %c0_30 = arith.constant 0 : index
    %67 = vector.load %arg2[%c5, %c0_30] : memref<13x128xf32, #tpu.memory_space<vmem>>, vector<1x128xf32>
    %68 = vector.broadcast %67 : vector<1x128xf32> to vector<8x128xf32>
    %69 = arith.addf %66, %68 : vector<8x128xf32>
    %c6 = arith.constant 6 : index
    %c0_31 = arith.constant 0 : index
    %70 = vector.load %arg2[%c6, %c0_31] : memref<13x128xf32, #tpu.memory_space<vmem>>, vector<1x128xf32>
    %c7 = arith.constant 7 : index
    %c0_32 = arith.constant 0 : index
    %71 = vector.load %arg2[%c7, %c0_32] : memref<13x128xf32, #tpu.memory_space<vmem>>, vector<1x128xf32>
    %cst_33 = arith.constant dense<0.000000e+00> : vector<8xf32>
    %72 = vector.multi_reduction <add>, %69, %cst_33 [1] : vector<8x128xf32> to vector<8xf32>
    %73 = vector.shape_cast %72 : vector<8xf32> to vector<8x1xf32>
    %cst_34 = arith.constant 0.020833334 : f32
    %74 = vector.broadcast %cst_34 : f32 to vector<8x1xf32>
    %75 = arith.mulf %73, %74 : vector<8x1xf32>
    %76 = arith.mulf %69, %69 : vector<8x128xf32>
    %cst_35 = arith.constant dense<0.000000e+00> : vector<8xf32>
    %77 = vector.multi_reduction <add>, %76, %cst_35 [1] : vector<8x128xf32> to vector<8xf32>
    %78 = vector.shape_cast %77 : vector<8xf32> to vector<8x1xf32>
    %cst_36 = arith.constant 0.020833334 : f32
    %79 = vector.broadcast %cst_36 : f32 to vector<8x1xf32>
    %80 = arith.mulf %78, %79 : vector<8x1xf32>
    %81 = arith.mulf %75, %75 : vector<8x1xf32>
    %82 = arith.subf %80, %81 : vector<8x1xf32>
    %cst_37 = arith.constant 0.000000e+00 : f32
    %83 = vector.broadcast %cst_37 : f32 to vector<8x1xf32>
    %84 = arith.maximumf %82, %83 : vector<8x1xf32>
    %85 = vector.broadcast %75 : vector<8x1xf32> to vector<8x128xf32>
    %86 = arith.subf %69, %85 : vector<8x128xf32>
    %cst_38 = arith.constant 9.99999974E-6 : f32
    %87 = vector.broadcast %cst_38 : f32 to vector<8x1xf32>
    %88 = arith.addf %84, %87 : vector<8x1xf32>
    %89 = math.rsqrt %88 : vector<8x1xf32>
    %90 = vector.broadcast %89 : vector<8x1xf32> to vector<8x128xf32>
    %91 = arith.mulf %86, %90 : vector<8x128xf32>
    %92 = vector.broadcast %70 : vector<1x128xf32> to vector<8x128xf32>
    %93 = arith.mulf %91, %92 : vector<8x128xf32>
    %94 = vector.broadcast %71 : vector<1x128xf32> to vector<8x128xf32>
    %95 = arith.addf %93, %94 : vector<8x128xf32>
    %96 = arith.addf %95, %43 : vector<8x128xf32>
    %c1_39 = arith.constant 1 : index
    %c0_40 = arith.constant 0 : index
    %c0_41 = arith.constant 0 : index
    %97 = vector.load %arg5[%c1_39, %c0_40, %c0_41] : memref<4x128x128xf32, #tpu.memory_space<vmem>>, vector<1x128x128xf32>
    %98 = vector.shape_cast %97 : vector<1x128x128xf32> to vector<128x128xf32>
    %cst_42 = arith.constant dense<0.000000e+00> : vector<8x128xf32>
    %99 = tpu.matmul %96, %98, %cst_42 {dimension_numbers = #tpu.dot_dimension_numbers<[1], [0], [0], [1], [0, 0, 1, 1], [], []>} : vector<8x128xf32>, vector<128x128xf32>, vector<8x128xf32> -> vector<8x128xf32>
    %c8 = arith.constant 8 : index
    %c0_43 = arith.constant 0 : index
    %100 = vector.load %arg2[%c8, %c0_43] : memref<13x128xf32, #tpu.memory_space<vmem>>, vector<1x128xf32>
    %101 = vector.broadcast %100 : vector<1x128xf32> to vector<8x128xf32>
    %102 = arith.addf %99, %101 : vector<8x128xf32>
    %cst_44 = arith.constant dense<0.000000e+00> : vector<8xf32>
    %103 = vector.multi_reduction <add>, %102, %cst_44 [1] : vector<8x128xf32> to vector<8xf32>
    %104 = vector.shape_cast %103 : vector<8xf32> to vector<8x1xf32>
    %cst_45 = arith.constant 0.020833334 : f32
    %105 = vector.broadcast %cst_45 : f32 to vector<8x1xf32>
    %106 = arith.mulf %104, %105 : vector<8x1xf32>
    %107 = arith.mulf %102, %102 : vector<8x128xf32>
    %cst_46 = arith.constant dense<0.000000e+00> : vector<8xf32>
    %108 = vector.multi_reduction <add>, %107, %cst_46 [1] : vector<8x128xf32> to vector<8xf32>
    %109 = vector.shape_cast %108 : vector<8xf32> to vector<8x1xf32>
    %cst_47 = arith.constant 0.020833334 : f32
    %110 = vector.broadcast %cst_47 : f32 to vector<8x1xf32>
    %111 = arith.mulf %109, %110 : vector<8x1xf32>
    %112 = arith.mulf %106, %106 : vector<8x1xf32>
    %113 = arith.subf %111, %112 : vector<8x1xf32>
    %cst_48 = arith.constant 0.000000e+00 : f32
    %114 = vector.broadcast %cst_48 : f32 to vector<8x1xf32>
    %115 = arith.maximumf %113, %114 : vector<8x1xf32>
    %116 = vector.broadcast %106 : vector<8x1xf32> to vector<8x128xf32>
    %117 = arith.subf %102, %116 : vector<8x128xf32>
    %cst_49 = arith.constant 9.99999974E-6 : f32
    %118 = vector.broadcast %cst_49 : f32 to vector<8x1xf32>
    %119 = arith.addf %115, %118 : vector<8x1xf32>
    %120 = math.rsqrt %119 : vector<8x1xf32>
    %121 = vector.broadcast %120 : vector<8x1xf32> to vector<8x128xf32>
    %122 = arith.mulf %117, %121 : vector<8x128xf32>
    %c2_50 = arith.constant 2 : index
    %c0_51 = arith.constant 0 : index
    %c0_52 = arith.constant 0 : index
    %123 = vector.load %arg5[%c2_50, %c0_51, %c0_52] : memref<4x128x128xf32, #tpu.memory_space<vmem>>, vector<1x128x128xf32>
    %124 = vector.shape_cast %123 : vector<1x128x128xf32> to vector<128x128xf32>
    %cst_53 = arith.constant dense<0.000000e+00> : vector<8x128xf32>
    %125 = tpu.matmul %122, %124, %cst_53 {dimension_numbers = #tpu.dot_dimension_numbers<[1], [0], [0], [1], [0, 0, 1, 1], [], []>} : vector<8x128xf32>, vector<128x128xf32>, vector<8x128xf32> -> vector<8x128xf32>
    %c9 = arith.constant 9 : index
    %c0_54 = arith.constant 0 : index
    %126 = vector.load %arg2[%c9, %c0_54] : memref<13x128xf32, #tpu.memory_space<vmem>>, vector<1x128xf32>
    %127 = vector.broadcast %126 : vector<1x128xf32> to vector<8x128xf32>
    %128 = arith.addf %125, %127 : vector<8x128xf32>
    %c10 = arith.constant 10 : index
    %c0_55 = arith.constant 0 : index
    %129 = vector.load %arg2[%c10, %c0_55] : memref<13x128xf32, #tpu.memory_space<vmem>>, vector<1x128xf32>
    %c11 = arith.constant 11 : index
    %c0_56 = arith.constant 0 : index
    %130 = vector.load %arg2[%c11, %c0_56] : memref<13x128xf32, #tpu.memory_space<vmem>>, vector<1x128xf32>
    %cst_57 = arith.constant dense<0.000000e+00> : vector<8xf32>
    %131 = vector.multi_reduction <add>, %128, %cst_57 [1] : vector<8x128xf32> to vector<8xf32>
    %132 = vector.shape_cast %131 : vector<8xf32> to vector<8x1xf32>
    %cst_58 = arith.constant 0.020833334 : f32
    %133 = vector.broadcast %cst_58 : f32 to vector<8x1xf32>
    %134 = arith.mulf %132, %133 : vector<8x1xf32>
    %135 = arith.mulf %128, %128 : vector<8x128xf32>
    %cst_59 = arith.constant dense<0.000000e+00> : vector<8xf32>
    %136 = vector.multi_reduction <add>, %135, %cst_59 [1] : vector<8x128xf32> to vector<8xf32>
    %137 = vector.shape_cast %136 : vector<8xf32> to vector<8x1xf32>
    %cst_60 = arith.constant 0.020833334 : f32
    %138 = vector.broadcast %cst_60 : f32 to vector<8x1xf32>
    %139 = arith.mulf %137, %138 : vector<8x1xf32>
    %140 = arith.mulf %134, %134 : vector<8x1xf32>
    %141 = arith.subf %139, %140 : vector<8x1xf32>
    %cst_61 = arith.constant 0.000000e+00 : f32
    %142 = vector.broadcast %cst_61 : f32 to vector<8x1xf32>
    %143 = arith.maximumf %141, %142 : vector<8x1xf32>
    %144 = vector.broadcast %134 : vector<8x1xf32> to vector<8x128xf32>
    %145 = arith.subf %128, %144 : vector<8x128xf32>
    %cst_62 = arith.constant 9.99999974E-6 : f32
    %146 = vector.broadcast %cst_62 : f32 to vector<8x1xf32>
    %147 = arith.addf %143, %146 : vector<8x1xf32>
    %148 = math.rsqrt %147 : vector<8x1xf32>
    %149 = vector.broadcast %148 : vector<8x1xf32> to vector<8x128xf32>
    %150 = arith.mulf %145, %149 : vector<8x128xf32>
    %151 = vector.broadcast %129 : vector<1x128xf32> to vector<8x128xf32>
    %152 = arith.mulf %150, %151 : vector<8x128xf32>
    %153 = vector.broadcast %130 : vector<1x128xf32> to vector<8x128xf32>
    %154 = arith.addf %152, %153 : vector<8x128xf32>
    %155 = arith.addf %154, %96 : vector<8x128xf32>
    %c3_63 = arith.constant 3 : index
    %c0_64 = arith.constant 0 : index
    %c0_65 = arith.constant 0 : index
    %156 = vector.load %arg5[%c3_63, %c0_64, %c0_65] : memref<4x128x128xf32, #tpu.memory_space<vmem>>, vector<1x128x128xf32>
    %157 = vector.shape_cast %156 : vector<1x128x128xf32> to vector<128x128xf32>
    %cst_66 = arith.constant dense<0.000000e+00> : vector<8x128xf32>
    %158 = tpu.matmul %155, %157, %cst_66 {dimension_numbers = #tpu.dot_dimension_numbers<[1], [0], [0], [1], [0, 0, 1, 1], [], []>} : vector<8x128xf32>, vector<128x128xf32>, vector<8x128xf32> -> vector<8x128xf32>
    %c12 = arith.constant 12 : index
    %c0_67 = arith.constant 0 : index
    %159 = vector.load %arg2[%c12, %c0_67] : memref<13x128xf32, #tpu.memory_space<vmem>>, vector<1x128xf32>
    %160 = vector.broadcast %159 : vector<1x128xf32> to vector<8x128xf32>
    %161 = arith.addf %158, %160 : vector<8x128xf32>
    %c0_68 = arith.constant 0 : index
    %c0_69 = arith.constant 0 : index
    %162 = vector.load %arg6[%c0_68, %c0_69] : memref<8x128xf32, #tpu.memory_space<vmem>>, vector<8x128xf32>
    tpu.vector_store %arg6[%c0_68, %c0_69], %161 {strides = array<i32>} : memref<8x128xf32, #tpu.memory_space<vmem>>, vector<8x128xf32>,
    return
  }
  func.func @transform_0(%arg0: i32) -> (i32, i32) {
    %c0_i32 = arith.constant 0 : i32
    %c0_i32_0 = arith.constant 0 : i32
    return %arg0, %c0_i32 : i32, i32
  }
  func.func @transform_1(%arg0: i32) -> (i32, i32) {
    %c0_i32 = arith.constant 0 : i32
    %c0_i32_0 = arith.constant 0 : i32
    %c0_i32_1 = arith.constant 0 : i32
    return %c0_i32, %c0_i32_0 : i32, i32
  }
  func.func @transform_2(%arg0: i32) -> (i32, i32, i32) {
    %c0_i32 = arith.constant 0 : i32
    %c0_i32_0 = arith.constant 0 : i32
    %c0_i32_1 = arith.constant 0 : i32
    %c0_i32_2 = arith.constant 0 : i32
    return %c0_i32, %c0_i32_0, %c0_i32_1 : i32, i32, i32
  }
  func.func @transform_3(%arg0: i32) -> (i32, i32, i32) {
    %c0_i32 = arith.constant 0 : i32
    %c0_i32_0 = arith.constant 0 : i32
    %c0_i32_1 = arith.constant 0 : i32
    %c0_i32_2 = arith.constant 0 : i32
    return %c0_i32, %c0_i32_0, %c0_i32_1 : i32, i32, i32
  }
  func.func @transform_4(%arg0: i32) -> (i32, i32, i32) {
    %c0_i32 = arith.constant 0 : i32
    %c0_i32_0 = arith.constant 0 : i32
    %c0_i32_1 = arith.constant 0 : i32
    %c0_i32_2 = arith.constant 0 : i32
    return %c0_i32, %c0_i32_0, %c0_i32_1 : i32, i32, i32
  }
  func.func @transform_5(%arg0: i32) -> (i32, i32) {
    %c0_i32 = arith.constant 0 : i32
    %c0_i32_0 = arith.constant 0 : i32
    return %arg0, %c0_i32 : i32, i32
  }
}

</mosaic_0001>

<bundles_post_ra>
// kernel: forward.1
= control target key start
LH: loop header
LB: loop body
LE: loop exit
PB: predicated region body
PF: predicated region fallthrough
CT: control target
= control target key end

     0   :  { %10 = vsyncpa [#allocation3], 0  ;;  %s1697_s0 = inlined_call_operand.vmem [shape: f32[16,32], index: 0, kind: input, shape index: {}]   ;;  %s1698_s1 = inlined_call_operand.vmem [shape: f32[13,128], index: 1, kind: input, shape index: {}]   ;;  %s1699_s2 = inlined_call_operand.hbm [shape: f32[1,32,128], index: 2, kind: input, shape index: {}]   ;;  %s1700_s3 = inlined_call_operand.hbm [shape: f32[1,128,256], index: 3, kind: input, shape index: {}]   ;;  %s1701_s4 = inlined_call_operand.hbm [shape: f32[4,128,128], index: 4, kind: input, shape index: {}]   ;;  %s1702_s5 = inlined_call_operand.vmem [shape: f32[16,128], index: 5, kind: output, shape index: {}]  }
   0x1   :  { %11 = vsyncpa [#allocation5], 0  ;;  %s1464_s18 = smov 0  }
   0x2 LB: > { %s1425_s19 = smov [#allocation4]   ;;  %s1470_s21 = sadd.s32 4294967295, %s1423_s18   ;;  %s1423_s18 = sphi %s1464_s18, %s17_s18  }
   0x3   : > { %s186_s20 = sshll.u32 %s1425_s19, 4  ;;  %p1025_p0 = scmp.ge.s32.totalorder %s1423_s18, 1  ;;  %s187_s20 = int_to_ptr.vmem [resolvable:$true] %s186_s20 }
   0x4   : > { %p158_p1 = scmp.lt.s32.totalorder %s1423_s18, 3  ;;  %p1298_p2 = scmp.eq.s32.totalorder %s1470_s21, 0 }
   0x5   : > { %s1426_s23 = smov [#allocation2]   ;;  %s1427_s26 = smov [#allocation6]  }
   0x6   : > { %p1475_p3 = pnand %p1025_p0, %p158_p1  ;;  %s173_s24 = sshll.u32 %s1426_s23, 4  ;;  %s1481_s24 = int_to_ptr.vmem [resolvable:$true] %s173_s24 }
   0x7   : > { %s1489_s27 = sshll.u32 %s1427_s26, 4  ;;  %s1342_s28 = scalar_lea.vmem %s187_s20, 4096  ;;  %s200_s27 = int_to_ptr.vmem [resolvable:$true] %s1489_s27 }
   0x8   : > { %p1288_p4 = pneg %p1475_p3  ;;  %p1343_p7 = scmp.ne.s32.totalorder %s187_s20, %s1342_s28 }
   0x9   : > { %p1350_p10 = scmp.lt.s32.totalorder %s187_s20, %s187_s20  ;;  %p1351_p11 = scmp.lt.s32.totalorder %s1342_s28, %s1342_s28 }
   0xa   : > { %p1485_p5 = pnand %p1298_p2, %p1288_p4 }
   0xb   : > { %p1352_p12 = por %p1351_p11, %p1350_p10 }
   0xc   : > { %p1333_p6 = pneg %p1485_p5 }
   0xe   : > { %p1345_p8 = pnand %p1343_p7, %p1333_p6 }
  0x10   : > { %p1346_p9 = pneg %p1345_p8 }
  0x12   : > { %p1353_p13 = pnand %p1352_p12, %p1346_p9 }
  0x14   : > { %1356 = shalt.err (!%p1353_p13)
}
  0x15   : > { %s1428_s29 = smov 256   ;;  %s1429_s30 = smov 16  }
  0x16   : > { %1294 = dma.hbm_to_vmem [thread:$0]  (!%p1485_p5), %s1700_s3, 4096, %s187_s20, [#allocation5], %s1428_s29, %s1428_s29, %s1429_s30  }
  0x17   : > { %s1368_s8 = scalar_lea.vmem %s1481_s24, 512  ;;  %p1376_p7 = scmp.lt.s32.totalorder %s1481_s24, %s1481_s24 }
  0x18   : > { %p1369_p0 = scmp.ne.s32.totalorder %s1481_s24, %s1368_s8  ;;  %p1377_p8 = scmp.lt.s32.totalorder %s1368_s8, %s1368_s8 }
  0x1a   : > { %p1371_p1 = pnand %p1369_p0, %p1333_p6  ;;  %p1378_p9 = por %p1377_p8, %p1376_p7 }
  0x1c   : > { %p1372_p4 = pneg %p1371_p1 }
  0x1e   : > { %p1379_p10 = pnand %p1378_p9, %p1372_p4 }
  0x20   : > { %1382 = shalt.err (!%p1379_p10)
}
  0x21   : > { %s1430_s9 = smov 128   ;;  %s1431_s10 = smov 8  }
  0x22   : > { %1291 = dma.hbm_to_vmem [thread:$0]  (!%p1485_p5), %s1699_s2, 512, %s1481_s24, [#allocation3], %s1430_s9, %s1430_s9, %s1431_s10  }
  0x23   : > { %s1394_s13 = scalar_lea.vmem %s200_s27, 8192  ;;  %p1402_p0 = scmp.lt.s32.totalorder %s200_s27, %s200_s27 }
  0x24   : > { %p1395_p11 = scmp.ne.s32.totalorder %s200_s27, %s1394_s13  ;;  %p1403_p1 = scmp.lt.s32.totalorder %s1394_s13, %s1394_s13 }
  0x26   : > { %p1397_p12 = pnand %p1395_p11, %p1333_p6  ;;  %p1404_p4 = por %p1403_p1, %p1402_p0 }
  0x28   : > { %p1398_p13 = pneg %p1397_p12 }
  0x2a   : > { %p1405_p7 = pnand %p1404_p4, %p1398_p13 }
  0x2c   : > { %1408 = shalt.err (!%p1405_p7)
}
  0x2d   : > { %1297 = dma.hbm_to_vmem [thread:$0]  (!%p1485_p5), %s1701_s4, 8192, %s200_s27, [#allocation5], %s1430_s9, %s1430_s9, %s1431_s10  }
  0x2e   : > { %222 = sbr.rel (%p1475_p3) target bundleno = 1906 (0x772), region = 40 }
  0x33   : > { %1414 = dma.done.wait (%p1298_p2), [#allocation3], 512  }
  0x34   : > { %1416 = vsyncadd (%p1298_p2), [#allocation3], 4294966784 }
  0x35   : > { %1418 = dma.done.wait (%p1298_p2), [#allocation5], 12288  }
  0x36   : > { %1420 = vsyncadd (%p1298_p2), [#allocation5], 4294955008  ;;  %p256_p6 = scmp.lt.s32.totalorder %s1470_s21, 1  ;;  %v1432_v0 = vmov 0.0   ;;  %vm1433_vm0 = vmmov 0   ;;  %v268_v1 = vld [vmem:[#allocation2 + $0x18] sm:$0xff] }
  0x37   : > { %1125 = vmatprep.subr.mxu0 %v1432_v0  ;;  %1133 = vmatprep.mubr.msk.f32.mxu0 %vm1433_vm0, %v1432_v0  ;;  %v267_v2 = vld [vmem:[#allocation2 + $0x10] sm:$0xff]  ;;  %v266_v3 = vld [vmem:[#allocation2 + $0x8] sm:$0xff]  ;;  %v379_v4 = vld [vmem:[#allocation4 + $0xf8] sm:$0xff]  ;;  %vm274_vm1 = vcmask 261120  }
  0x38   : > { %s1706_s21 = smov (!%p256_p6, %s1470_s21), 1  ;;  %444 = vmatprep.mubr.f32.mxu1 %v1432_v0  ;;  %1126 = vmatpush3.msra.mxu0 %v268_v1  ;;  %v378_v5 = vld [vmem:[#allocation4 + $0xf0] sm:$0xff]  ;;  %v377_v6 = vld [vmem:[#allocation4 + $0xe8] sm:$0xff]  ;;  %v376_v7 = vld [vmem:[#allocation4 + $0xe0] sm:$0xff] }
  0x39   : > { %s1034_s16 = sshll.u32 %s1706_s21, 3  ;;  %1127 = vmatprep.subr.mxu0 %v1432_v0  ;;  %380 = vmatprep.subr.mxu1 %v379_v4  ;;  %v375_v8 = vld [vmem:[#allocation4 + $0xd8] sm:$0xff]  ;;  %v265_v9 = vld [vmem:[#allocation2] sm:$0xff]  ;;  %v374_v10 = vld [vmem:[#allocation4 + $0xd0] sm:$0xff] }
  0x3a   : > { %s259_s20 = scalar_lea.vmem %s1697_s0, %s1034_s16  ;;  %1128 = vmatpush3.msra.mxu0 %v267_v2  ;;  %381 = vmatpush1.msra.mxu1 %v378_v5  ;;  %v373_v12 = vld [vmem:[#allocation4 + $0xc8] sm:$0xff]  ;;  %v372_v13 = vld [vmem:[#allocation4 + $0xc0] sm:$0xff]  ;;  %v371_v14 = vld [vmem:[#allocation4 + $0xb8] sm:$0xff]  ;;  %s263_s28 = scalar_lea.vmem %s1702_s5, %s1034_s16 }
  0x3b   : > { %1129 = vmatprep.subr.mxu0 %v1432_v0  ;;  %382 = vmatprep.subr.mxu1 %v377_v6  ;;  %v264_v11 = vld [vmem:[%s259_s20] sm:$0xff]  ;;  %v370_v15 = vld [vmem:[#allocation4 + $0xb0] sm:$0xff]  ;;  %v369_v16 = vld [vmem:[#allocation4 + $0xa8] sm:$0xff] }
  0x3c   : > { %1130 = vmatpush3.msra.mxu0 %v266_v3  ;;  %383 = vmatpush1.msra.mxu1 %v376_v7  ;;  %v368_v17 = vld [vmem:[#allocation4 + $0xa0] sm:$0xff]  ;;  %v367_v18 = vld [vmem:[#allocation4 + $0x98] sm:$0xff]  ;;  %v366_v19 = vld [vmem:[#allocation4 + $0x90] sm:$0xff] }
  0x3d   : > { %1131 = vmatprep.subr.mxu0 %v1432_v0  ;;  %384 = vmatprep.subr.mxu1 %v375_v8  ;;  %v365_v20 = vld [vmem:[#allocation4 + $0x88] sm:$0xff]  ;;  %v364_v21 = vld [vmem:[#allocation4 + $0x80] sm:$0xff]  ;;  %v363_v22 = vld [vmem:[#allocation4 + $0x78] sm:$0xff] }
  0x3e   : > { %1132 = vmatpush3.msra.mxu0 %v265_v9  ;;  %385 = vmatpush1.msra.mxu1 %v374_v10  ;;  %v362_v23 = vld [vmem:[#allocation4 + $0x70] sm:$0xff]  ;;  %v361_v24 = vld [vmem:[#allocation4 + $0x68] sm:$0xff]  ;;  %v360_v25 = vld [vmem:[#allocation4 + $0x60] sm:$0xff] }
  0x3f   : > { %1134 = vmatmul.mubr.msk.f32.vlgmr.msra.gmra.mxu0 %vm274_vm1, %v264_v11  ;;  %386 = vmatprep.subr.mxu1 %v373_v12  ;;  %v359_v26 = vld [vmem:[#allocation4 + $0x58] sm:$0xff]  ;;  %v358_v27 = vld [vmem:[#allocation4 + $0x50] sm:$0xff]  ;;  %v357_v28 = vld [vmem:[#allocation4 + $0x48] sm:$0xff] }
  0x40   : > { %387 = vmatpush1.msra.mxu1 %v372_v13  ;;  %1136 = vmatprep.subr.mxu0 %v1432_v0  ;;  %v356_v29 = vld [vmem:[#allocation4 + $0x40] sm:$0xff]  ;;  %v355_v30 = vld [vmem:[#allocation4 + $0x38] sm:$0xff]  ;;  %v354_v31 = vld [vmem:[#allocation4 + $0x30] sm:$0xff] }
  0x41   : > { %388 = vmatprep.subr.mxu1 %v371_v14  ;;  %1168 = vmatprep.mubr.msk.f32.mxu0 %vm1433_vm0, %v1432_v0  ;;  %v353_v32 = vld [vmem:[#allocation4 + $0x28] sm:$0xff]  ;;  %v352_v33 = vld [vmem:[#allocation4 + $0x20] sm:$0xff]  ;;  %v351_v34 = vld [vmem:[#allocation4 + $0x18] sm:$0xff] }
  0x42   : > { %389 = vmatpush1.msra.mxu1 %v370_v15  ;;  %v350_v35 = vld [vmem:[#allocation4 + $0x10] sm:$0xff]  ;;  %v349_v36 = vld [vmem:[#allocation4 + $0x8] sm:$0xff]  ;;  %v348_v37 = vld [vmem:[#allocation4] sm:$0xff] }
  0x43   : > { %390 = vmatprep.subr.mxu1 %v369_v16  ;;  %v1036_v38 = vld [vmem:[%s1698_s1] ss:$0 sm:$0xff]  ;;  %v518_v42 = vld [vmem:[#allocation6 + $0x78] sm:$0xff]  ;;  %v517_v43 = vld [vmem:[#allocation6 + $0x70] sm:$0xff] }
  0x44   : > { %391 = vmatpush1.msra.mxu1 %v368_v17  ;;  %1137 = vmatpush3.msra.mxu0 %v518_v42  ;;  %v1038_v44 = vld [vmem:[%s1698_s1 + $0x1] ss:$0 sm:$0xff]  ;;  %v1039_v46 = vld [vmem:[%s1698_s1 + $0x2] ss:$0 sm:$0xff]  ;;  %v516_v52 = vld [vmem:[#allocation6 + $0x68] sm:$0xff] }
  0x45   : > { %392 = vmatprep.subr.mxu1 %v367_v18  ;;  %1138 = vmatprep.subr.mxu0 %v1432_v0  ;;  %v515_v53 = vld [vmem:[#allocation6 + $0x60] sm:$0xff]  ;;  %v514_v54 = vld [vmem:[#allocation6 + $0x58] sm:$0xff]  ;;  %v513_v55 = vld [vmem:[#allocation6 + $0x50] sm:$0xff] }
  0x46   : > { %393 = vmatpush1.msra.mxu1 %v366_v19  ;;  %1139 = vmatpush3.msra.mxu0 %v517_v43  ;;  %v512_v56 = vld [vmem:[#allocation6 + $0x48] sm:$0xff]  ;;  %v511_v57 = vld [vmem:[#allocation6 + $0x40] sm:$0xff]  ;;  %v510_v58 = vld [vmem:[#allocation6 + $0x38] sm:$0xff] }
  0x47   : > { %394 = vmatprep.subr.mxu1 %v365_v20  ;;  %1140 = vmatprep.subr.mxu0 %v1432_v0  ;;  %v509_v59 = vld [vmem:[#allocation6 + $0x30] sm:$0xff]  ;;  %v508_v60 = vld [vmem:[#allocation6 + $0x28] sm:$0xff]  ;;  %v507_v61 = vld [vmem:[#allocation6 + $0x20] sm:$0xff] }
  0x48   : > { %395 = vmatpush1.msra.mxu1 %v364_v21  ;;  %1141 = vmatpush3.msra.mxu0 %v516_v52  ;;  %v506_v62 = vld [vmem:[#allocation6 + $0x18] sm:$0xff]  ;;  %v505_v63 = vld [vmem:[#allocation6 + $0x10] sm:$0xff]  ;;  %v504_v1 = vld [vmem:[#allocation6 + $0x8] sm:$0xff] }
  0x49   : > { %396 = vmatprep.subr.mxu1 %v363_v22  ;;  %1142 = vmatprep.subr.mxu0 %v1432_v0  ;;  %v503_v2 = vld [vmem:[#allocation6] sm:$0xff]  ;;  %v637_v19 = vld [vmem:[#allocation6 + $0xf8] sm:$0xff]  ;;  %v636_v20 = vld [vmem:[#allocation6 + $0xf0] sm:$0xff] }
  0x4a   : > { %397 = vmatpush1.msra.mxu1 %v362_v23  ;;  %1143 = vmatpush3.msra.mxu0 %v515_v53  ;;  %v1042_v14 = vld [vmem:[%s1698_s1 + $0x5] ss:$0 sm:$0xff]  ;;  %v635_v21 = vld [vmem:[#allocation6 + $0xe8] sm:$0xff]  ;;  %v633_v23 = vld [vmem:[#allocation6 + $0xd8] sm:$0xff] }
  0x4b   : > { %398 = vmatprep.subr.mxu1 %v361_v24  ;;  %1144 = vmatprep.subr.mxu0 %v1432_v0  ;;  %v634_v22 = vld [vmem:[#allocation6 + $0xe0] sm:$0xff]  ;;  %v632_v24 = vld [vmem:[#allocation6 + $0xd0] sm:$0xff] }
  0x4c   : > { %399 = vmatpush1.msra.mxu1 %v360_v25  ;;  %1145 = vmatpush3.msra.mxu0 %v514_v54  ;;  %v631_v25 = vld [vmem:[#allocation6 + $0xc8] sm:$0xff] }
  0x4d   : > { %400 = vmatprep.subr.mxu1 %v359_v26  ;;  %1146 = vmatprep.subr.mxu0 %v1432_v0  ;;  %v630_v26 = vld [vmem:[#allocation6 + $0xc0] sm:$0xff] }
  0x4e   : > { %401 = vmatpush1.msra.mxu1 %v358_v27  ;;  %1147 = vmatpush3.msra.mxu0 %v513_v55  ;;  %v629_v27 = vld [vmem:[#allocation6 + $0xb8] sm:$0xff]  ;;  %v1040_v55 = vld [vmem:[%s1698_s1 + $0x3] ss:$0 sm:$0xff] }
  0x4f   : > { %402 = vmatprep.subr.mxu1 %v357_v28  ;;  %1148 = vmatprep.subr.mxu0 %v1432_v0  ;;  %v628_v28 = vld [vmem:[#allocation6 + $0xb0] sm:$0xff] }
  0x50   : > { %403 = vmatpush1.msra.mxu1 %v356_v29  ;;  %1149 = vmatpush3.msra.mxu0 %v512_v56  ;;  %v627_v29 = vld [vmem:[#allocation6 + $0xa8] sm:$0xff] }
  0x51   : > { %404 = vmatprep.subr.mxu1 %v355_v30  ;;  %1150 = vmatprep.subr.mxu0 %v1432_v0  ;;  %v626_v30 = vld [vmem:[#allocation6 + $0xa0] sm:$0xff] }
  0x52   : > { %405 = vmatpush1.msra.mxu1 %v354_v31  ;;  %1151 = vmatpush3.msra.mxu0 %v511_v57  ;;  %v625_v31 = vld [vmem:[#allocation6 + $0x98] sm:$0xff] }
  0x53   : > { %406 = vmatprep.subr.mxu1 %v353_v32  ;;  %1152 = vmatprep.subr.mxu0 %v1432_v0  ;;  %v624_v32 = vld [vmem:[#allocation6 + $0x90] sm:$0xff] }
  0x54   : > { %407 = vmatpush1.msra.mxu1 %v352_v33  ;;  %1153 = vmatpush3.msra.mxu0 %v510_v58  ;;  %v623_v33 = vld [vmem:[#allocation6 + $0x88] sm:$0xff]  ;;  %v1043_v58 = vld [vmem:[%s1698_s1 + $0x6] ss:$0 sm:$0xff] }
  0x55   : > { %408 = vmatprep.subr.mxu1 %v351_v34  ;;  %1154 = vmatprep.subr.mxu0 %v1432_v0  ;;  %v622_v34 = vld [vmem:[#allocation6 + $0x80] sm:$0xff] }
  0x56   : > { %409 = vmatpush1.msra.mxu1 %v350_v35  ;;  %1155 = vmatpush3.msra.mxu0 %v509_v59 }
  0x57   : > { %410 = vmatprep.subr.mxu1 %v349_v36  ;;  %1156 = vmatprep.subr.mxu0 %v1432_v0 }
  0x58   : > { %411 = vmatpush1.msra.mxu1 %v348_v37  ;;  %1157 = vmatpush3.msra.mxu0 %v508_v60 }
  0x59   : > { %1171 = vmatprep.subr.mxu1 %v1432_v0  ;;  %1158 = vmatprep.subr.mxu0 %v1432_v0 }
  0x5a   : > { %1159 = vmatpush3.msra.mxu0 %v507_v61  ;;  %v1041_v61 = vld [vmem:[%s1698_s1 + $0x4] ss:$0 sm:$0xff] }
  0x5b   : > { %1160 = vmatprep.subr.mxu0 %v1432_v0 }
  0x5c   : > { %1161 = vmatpush3.msra.mxu0 %v506_v62 }
  0x5d   : > { %1162 = vmatprep.subr.mxu0 %v1432_v0 }
  0x5e   : > { %1163 = vmatpush3.msra.mxu0 %v505_v63 }
  0x5f   : > { %1164 = vmatprep.subr.mxu0 %v1432_v0 }
  0x60   : > { %1165 = vmatpush3.msra.mxu0 %v504_v1 }
  0x61   : > { %1166 = vmatprep.subr.mxu0 %v1432_v0 }
  0x62   : > { %1167 = vmatpush3.msra.mxu0 %v503_v2 }
  0x63   : > { %1206 = vmatprep.subr.mxu0 %v1432_v0 }
  0xff   : > { %v344_v39 = vpop.f32.mrf.mxu0 }
 0x100   : > { %v345_v40 = vadd.f32 %v1036_v38, %v344_v39 }
 0x101   : > { %v1135_v41 = vpop.f32.mrf.mxu0 }
 0x102   : > { %445 = vmatmul.mubr.f32.vlgmr.msra.gmra.mxu1 %v345_v40 }
 0x103   : > { %1203 = vmatprep.mubr.msk.f32.mxu1 %vm1433_vm0, %v1432_v0  ;;  %1172 = vmatpush3.msra.mxu1 %v637_v19  ;;  %v732_v19 = vld [vmem:[#allocation6 + $0x120] sm:$0xff] }
 0x104   : > { %1173 = vmatprep.subr.mxu1 %v1432_v0 }
 0x105   : > { %1174 = vmatpush3.msra.mxu1 %v636_v20  ;;  %v731_v20 = vld [vmem:[#allocation6 + $0x118] sm:$0xff] }
 0x106   : > { %1175 = vmatprep.subr.mxu1 %v1432_v0 }
 0x107   : > { %1176 = vmatpush3.msra.mxu1 %v635_v21  ;;  %v730_v21 = vld [vmem:[#allocation6 + $0x110] sm:$0xff] }
 0x108   : > { %1177 = vmatprep.subr.mxu1 %v1432_v0 }
 0x109   : > { %1178 = vmatpush3.msra.mxu1 %v634_v22  ;;  %v729_v22 = vld [vmem:[#allocation6 + $0x108] sm:$0xff] }
 0x10a   : > { %1179 = vmatprep.subr.mxu1 %v1432_v0 }
 0x10b   : > { %1180 = vmatpush3.msra.mxu1 %v633_v23  ;;  %v728_v23 = vld [vmem:[#allocation6 + $0x100] sm:$0xff] }
 0x10c   : > { %1181 = vmatprep.subr.mxu1 %v1432_v0 }
 0x10d   : > { %1182 = vmatpush3.msra.mxu1 %v632_v24 }
 0x10e   : > { %1183 = vmatprep.subr.mxu1 %v1432_v0 }
 0x10f   : > { %1184 = vmatpush3.msra.mxu1 %v631_v25 }
 0x110   : > { %1185 = vmatprep.subr.mxu1 %v1432_v0 }
 0x111   : > { %1186 = vmatpush3.msra.mxu1 %v630_v26 }
 0x112   : > { %1187 = vmatprep.subr.mxu1 %v1432_v0 }
 0x113   : > { %1188 = vmatpush3.msra.mxu1 %v629_v27 }
 0x114   : > { %1189 = vmatprep.subr.mxu1 %v1432_v0 }
 0x115   : > { %1190 = vmatpush3.msra.mxu1 %v628_v28 }
 0x116   : > { %1191 = vmatprep.subr.mxu1 %v1432_v0 }
 0x117   : > { %1192 = vmatpush3.msra.mxu1 %v627_v29 }
 0x118   : > { %1193 = vmatprep.subr.mxu1 %v1432_v0 }
 0x119   : > { %1194 = vmatpush3.msra.mxu1 %v626_v30 }
 0x11a   : > { %1195 = vmatprep.subr.mxu1 %v1432_v0 }
 0x11b   : > { %1196 = vmatpush3.msra.mxu1 %v625_v31 }
 0x11c   : > { %1197 = vmatprep.subr.mxu1 %v1432_v0 }
 0x11d   : > { %1198 = vmatpush3.msra.mxu1 %v624_v32 }
 0x11e   : > { %1199 = vmatprep.subr.mxu1 %v1432_v0 }
 0x11f   : > { %1200 = vmatpush3.msra.mxu1 %v623_v33 }
 0x120   : > { %1201 = vmatprep.subr.mxu1 %v1432_v0 }
 0x121   : > { %1202 = vmatpush3.msra.mxu1 %v622_v34 }
 0x122   : > { %1241 = vmatprep.subr.mxu1 %v1432_v0 }
 0x1c2   : > { %v446_v45 = vpop.f32.mrf.mxu1 }
 0x1c3   : > { %v1567_v47 = vadd.f32 %v1038_v44, %v446_v45 }
 0x1c4   : > { %v448_v48 = vpop.f32.mrf.mxu1 }
 0x1c5   : > { %v1569_v49 = vadd.f32 %v1039_v46, %v448_v48  ;;  %489 = vadd.xlane.f32.xlu0 %v1567_v47  ;;  %v492_v50 = vmul.f32 %v1567_v47, %v1567_v47 }
 0x1c7   : > { %465 = vadd.xlane.f32.xlu1 %v1569_v49  ;;  %v468_v51 = vmul.f32 %v1569_v49, %v1569_v49 }
 0x1c9   : > { %493 = vadd.xlane.f32.xlu0 %v492_v50 }
 0x1cd   : > { %469 = vadd.xlane.f32.xlu0 %v468_v51 }
 0x24e   : > { %v490_v3 = vpop.xlane.xlu0 %489 }
 0x24f   : > { %v491_v4 = vmul.f32 0.020833334, %v490_v3  ;;  %v743_v3 = vld [vmem:[#allocation6 + $0x178] sm:$0xff] }
 0x250   : > { %v466_v35 = vpop.xlane.xlu1 %465 }
 0x251   : > { %v496_v6 = vmul.f32 %v491_v4, %v491_v4  ;;  %v499_v11 = vsub.f32 %v1567_v47, %v491_v4  ;;  %v467_v37 = vmul.f32 0.020833334, %v466_v35  ;;  %v742_v4 = vld [vmem:[#allocation6 + $0x170] sm:$0xff]  ;;  %v1046_v35 = vld [vmem:[%s1698_s1 + $0x9] ss:$0 sm:$0xff] }
 0x252   : > { %v494_v5 = vpop.xlane.xlu0 %493 }
 0x253   : > { %v495_v7 = vmul.f32 0.020833334, %v494_v5  ;;  %v472_v39 = vmul.f32 %v467_v37, %v467_v37  ;;  %v475_v53 = vsub.f32 %v1569_v49, %v467_v37  ;;  %v1044_v49 = vld [vmem:[%s1698_s1 + $0x7] ss:$0 sm:$0xff]  ;;  %v741_v5 = vld [vmem:[#allocation6 + $0x168] sm:$0xff] }
 0x255   : > { %v497_v8 = vsub.f32 %v495_v7, %v496_v6  ;;  %v1045_v6 = vld [vmem:[%s1698_s1 + $0x8] ss:$0 sm:$0xff] }
 0x256   : > { %v470_v36 = vpop.xlane.xlu0 %469 }
 0x257   : > { %v498_v9 = vmax.f32 %v497_v8, 0.0  ;;  %v471_v38 = vmul.f32 0.020833334, %v470_v36 }
 0x259   : > { %v500_v10 = vadd.f32 1e-05, %v498_v9  ;;  %v473_v40 = vsub.f32 %v471_v38, %v472_v39 }
 0x25b   : > { %1321 = vrsqrt.f32 %v500_v10  ;;  %v474_v41 = vmax.f32 %v473_v40, 0.0  ;;  %v862_v40 = vld [vmem:[#allocation6 + $0x1f8] sm:$0xff] }
 0x25d   : > { %v476_v44 = vadd.f32 1e-05, %v474_v41  ;;  %v861_v41 = vld [vmem:[#allocation6 + $0x1f0] sm:$0xff] }
 0x25f   : > { %1323 = vrsqrt.f32 %v476_v44  ;;  %v858_v44 = vld [vmem:[#allocation6 + $0x1d8] sm:$0xff] }
 0x268   : > { %v1322_v12 = vpop.eup %1321 }
 0x269   : > { %v502_v13 = vmul.f32 %v1322_v12, %v499_v11  ;;  %v740_v11 = vld [vmem:[#allocation6 + $0x160] sm:$0xff]  ;;  %v739_v12 = vld [vmem:[#allocation6 + $0x158] sm:$0xff] }
 0x26b   : > { %1169 = vmatmul.mubr.f32.vlgmr.msra.gmra.mxu0 %v502_v13  ;;  %v738_v13 = vld [vmem:[#allocation6 + $0x150] sm:$0xff] }
 0x26c   : > { %1238 = vmatprep.mubr.msk.f32.mxu0 %vm1433_vm0, %v1432_v0  ;;  %v1324_v52 = vpop.eup %1323  ;;  %1207 = vmatpush3.msra.mxu0 %v743_v3 }
 0x26d   : > { %v478_v54 = vmul.f32 %v1324_v52, %v475_v53  ;;  %1208 = vmatprep.subr.mxu0 %v1432_v0  ;;  %v851_v52 = vld [vmem:[#allocation6 + $0x1a0] sm:$0xff]  ;;  %v850_v53 = vld [vmem:[#allocation6 + $0x198] sm:$0xff] }
 0x26e   : > { %1209 = vmatpush3.msra.mxu0 %v742_v4  ;;  %v1047_v4 = vld [vmem:[%s1698_s1 + $0xa] ss:$0 sm:$0xff] }
 0x26f   : > { %v483_v59 = vmul.f32 %v1040_v55, %v478_v54  ;;  %1210 = vmatprep.subr.mxu0 %v1432_v0  ;;  %v849_v54 = vld [vmem:[#allocation6 + $0x190] sm:$0xff]  ;;  %v848_v55 = vld [vmem:[#allocation6 + $0x188] sm:$0xff] }
 0x270   : > { %1211 = vmatpush3.msra.mxu0 %v741_v5 }
 0x271   : > { %v488_v63 = vadd.f32 %v1041_v61, %v483_v59  ;;  %1212 = vmatprep.subr.mxu0 %v1432_v0 }
 0x272   : > { %1213 = vmatpush3.msra.mxu0 %v740_v11 }
 0x273   : > { %1214 = vmatprep.subr.mxu0 %v1432_v0 }
 0x274   : > { %1215 = vmatpush3.msra.mxu0 %v739_v12 }
 0x275   : > { %1216 = vmatprep.subr.mxu0 %v1432_v0 }
 0x276   : > { %1217 = vmatpush3.msra.mxu0 %v738_v13 }
 0x277   : > { %1218 = vmatprep.subr.mxu0 %v1432_v0 }
 0x32b   : > { %v590_v15 = vpop.f32.mrf.mxu0 }
 0x32c   : > { %v1597_v16 = vadd.f32 %v1042_v14, %v590_v15  ;;  %v737_v14 = vld [vmem:[#allocation6 + $0x148] sm:$0xff]  ;;  %v736_v15 = vld [vmem:[#allocation6 + $0x140] sm:$0xff] }
 0x32d   : > { %v1170_v17 = vpop.f32.mrf.mxu0  ;;  %1219 = vmatpush3.msra.mxu0 %v737_v14 }
 0x32e   : > { %596 = vadd.xlane.f32.xlu1 %v1597_v16  ;;  %v599_v18 = vmul.f32 %v1597_v16, %v1597_v16  ;;  %1220 = vmatprep.subr.mxu0 %v1432_v0  ;;  %v734_v17 = vld [vmem:[#allocation6 + $0x130] sm:$0xff] }
 0x32f   : > { %1221 = vmatpush3.msra.mxu0 %v736_v15 }
 0x330   : > { %1222 = vmatprep.subr.mxu0 %v1432_v0 }
 0x332   : > { %600 = vadd.xlane.f32.xlu1 %v599_v18  ;;  %v733_v18 = vld [vmem:[#allocation6 + $0x128] sm:$0xff] }
 0x3b7   : > { %v597_v42 = vpop.xlane.xlu1 %596 }
 0x3b8   : > { %v598_v43 = vmul.f32 0.020833334, %v597_v42  ;;  %v860_v42 = vld [vmem:[#allocation6 + $0x1e8] sm:$0xff] }
 0x3ba   : > { %v603_v46 = vmul.f32 %v598_v43, %v598_v43  ;;  %v606_v56 = vsub.f32 %v1597_v16, %v598_v43  ;;  %v735_v16 = vld [vmem:[#allocation6 + $0x138] sm:$0xff]  ;;  %v859_v43 = vld [vmem:[#allocation6 + $0x1e0] sm:$0xff] }
 0x3bb   : > { %v601_v45 = vpop.xlane.xlu1 %600  ;;  %1223 = vmatpush3.msra.mxu0 %v735_v16 }
 0x3bc   : > { %v602_v47 = vmul.f32 0.020833334, %v601_v45  ;;  %1224 = vmatprep.subr.mxu0 %v1432_v0  ;;  %v857_v45 = vld [vmem:[#allocation6 + $0x1d0] sm:$0xff] }
 0x3bd   : > { %1225 = vmatpush3.msra.mxu0 %v734_v17 }
 0x3be   : > { %v604_v48 = vsub.f32 %v602_v47, %v603_v46  ;;  %1226 = vmatprep.subr.mxu0 %v1432_v0  ;;  %v856_v46 = vld [vmem:[#allocation6 + $0x1c8] sm:$0xff]  ;;  %v855_v47 = vld [vmem:[#allocation6 + $0x1c0] sm:$0xff] }
 0x3bf   : > { %1227 = vmatpush3.msra.mxu0 %v733_v18 }
 0x3c0   : > { %v605_v50 = vmax.f32 %v604_v48, 0.0  ;;  %1228 = vmatprep.subr.mxu0 %v1432_v0  ;;  %v854_v48 = vld [vmem:[#allocation6 + $0x1b8] sm:$0xff] }
 0x3c1   : > { %1229 = vmatpush3.msra.mxu0 %v732_v19 }
 0x3c2   : > { %v607_v51 = vadd.f32 1e-05, %v605_v50  ;;  %1230 = vmatprep.subr.mxu0 %v1432_v0  ;;  %v853_v50 = vld [vmem:[#allocation6 + $0x1b0] sm:$0xff] }
 0x3c3   : > { %1231 = vmatpush3.msra.mxu0 %v731_v20 }
 0x3c4   : > { %1325 = vrsqrt.f32 %v607_v51  ;;  %1232 = vmatprep.subr.mxu0 %v1432_v0  ;;  %v852_v51 = vld [vmem:[#allocation6 + $0x1a8] sm:$0xff] }
 0x3c5   : > { %1233 = vmatpush3.msra.mxu0 %v730_v21 }
 0x3c6   : > { %1234 = vmatprep.subr.mxu0 %v1432_v0 }
 0x3c7   : > { %1235 = vmatpush3.msra.mxu0 %v729_v22 }
 0x3c8   : > { %1236 = vmatprep.subr.mxu0 %v1432_v0 }
 0x3c9   : > { %1237 = vmatpush3.msra.mxu0 %v728_v23 }
 0x3d1   : > { %v1326_v57 = vpop.eup %1325 }
 0x3d2   : > { %v609_v60 = vmul.f32 %v1326_v57, %v606_v56  ;;  %v847_v56 = vld [vmem:[#allocation6 + $0x180] sm:$0xff] }
 0x3d4   : > { %v614_v62 = vmul.f32 %v1043_v58, %v609_v60 }
 0x3d6   : > { %v619_v1 = vadd.f32 %v1044_v49, %v614_v62 }
 0x3d8   : > { %v1632_v2 = vadd.f32 %v619_v1, %v488_v63 }
 0x3da   : > { %1204 = vmatmul.mubr.f32.vlgmr.msra.gmra.mxu1 %v1632_v2 }
 0x3db   : > { %1273 = vmatprep.mubr.msk.f32.mxu1 %vm1433_vm0, %v1432_v0  ;;  %1242 = vmatpush3.msra.mxu1 %v862_v40 }
 0x3dc   : > { %1243 = vmatprep.subr.mxu1 %v1432_v0 }
 0x3dd   : > { %1244 = vmatpush3.msra.mxu1 %v861_v41 }
 0x3de   : > { %1245 = vmatprep.subr.mxu1 %v1432_v0 }
 0x3df   : > { %1246 = vmatpush3.msra.mxu1 %v860_v42 }
 0x3e0   : > { %1247 = vmatprep.subr.mxu1 %v1432_v0 }
 0x3e1   : > { %1248 = vmatpush3.msra.mxu1 %v859_v43 }
 0x3e2   : > { %1249 = vmatprep.subr.mxu1 %v1432_v0 }
 0x3e3   : > { %1250 = vmatpush3.msra.mxu1 %v858_v44 }
 0x3e4   : > { %1251 = vmatprep.subr.mxu1 %v1432_v0 }
 0x3e5   : > { %1252 = vmatpush3.msra.mxu1 %v857_v45 }
 0x3e6   : > { %1253 = vmatprep.subr.mxu1 %v1432_v0 }
 0x3e7   : > { %1254 = vmatpush3.msra.mxu1 %v856_v46 }
 0x3e8   : > { %1255 = vmatprep.subr.mxu1 %v1432_v0 }
 0x3e9   : > { %1256 = vmatpush3.msra.mxu1 %v855_v47 }
 0x3ea   : > { %1257 = vmatprep.subr.mxu1 %v1432_v0 }
 0x3eb   : > { %1258 = vmatpush3.msra.mxu1 %v854_v48 }
 0x3ec   : > { %1259 = vmatprep.subr.mxu1 %v1432_v0 }
 0x3ed   : > { %1260 = vmatpush3.msra.mxu1 %v853_v50 }
 0x3ee   : > { %1261 = vmatprep.subr.mxu1 %v1432_v0 }
 0x3ef   : > { %1262 = vmatpush3.msra.mxu1 %v852_v51 }
 0x3f0   : > { %1263 = vmatprep.subr.mxu1 %v1432_v0 }
 0x3f1   : > { %1264 = vmatpush3.msra.mxu1 %v851_v52 }
 0x3f2   : > { %1265 = vmatprep.subr.mxu1 %v1432_v0 }
 0x3f3   : > { %1266 = vmatpush3.msra.mxu1 %v850_v53 }
 0x3f4   : > { %1267 = vmatprep.subr.mxu1 %v1432_v0 }
 0x3f5   : > { %1268 = vmatpush3.msra.mxu1 %v849_v54 }
 0x3f6   : > { %1269 = vmatprep.subr.mxu1 %v1432_v0 }
 0x3f7   : > { %1270 = vmatpush3.msra.mxu1 %v848_v55 }
 0x3f8   : > { %1271 = vmatprep.subr.mxu1 %v1432_v0  ;;  %v1048_v0 = vld [vmem:[%s1698_s1 + $0xb] ss:$0 sm:$0xff] }
 0x3f9   : > { %1272 = vmatpush3.msra.mxu1 %v847_v56 }
 0x49a   : > { %v709_v7 = vpop.f32.mrf.mxu1 }
 0x49b   : > { %v710_v8 = vadd.f32 %v1045_v6, %v709_v7 }
 0x49c   : > { %v1205_v9 = vpop.f32.mrf.mxu1 }
 0x49d   : > { %713 = vadd.xlane.f32.xlu0 %v710_v8  ;;  %v716_v10 = vmul.f32 %v710_v8, %v710_v8  ;;  %v1049_v9 = vld [vmem:[%s1698_s1 + $0xc] ss:$0 sm:$0xff] }
 0x49f   : > { %717 = vadd.xlane.f32.xlu1 %v716_v10 }
 0x526   : > { %v714_v24 = vpop.xlane.xlu0 %713 }
 0x527   : > { %v715_v25 = vmul.f32 0.020833334, %v714_v24 }
 0x528   : > { %v718_v26 = vpop.xlane.xlu1 %717 }
 0x529   : > { %v720_v27 = vmul.f32 %v715_v25, %v715_v25  ;;  %v719_v28 = vmul.f32 0.020833334, %v718_v26  ;;  %v723_v32 = vsub.f32 %v710_v8, %v715_v25 }
 0x52b   : > { %v721_v29 = vsub.f32 %v719_v28, %v720_v27 }
 0x52d   : > { %v722_v30 = vmax.f32 %v721_v29, 0.0 }
 0x52f   : > { %v724_v31 = vadd.f32 1e-05, %v722_v30 }
 0x531   : > { %1327 = vrsqrt.f32 %v724_v31 }
 0x53e   : > { %v1328_v33 = vpop.eup %1327 }
 0x53f   : > { %v726_v34 = vmul.f32 %v1328_v33, %v723_v32 }
 0x541   : > { %1239 = vmatmul.mubr.f32.vlgmr.msra.gmra.mxu0 %v726_v34 }
 0x601   : > { %v815_v36 = vpop.f32.mrf.mxu0 }
 0x602   : > { %v1658_v37 = vadd.f32 %v1046_v35, %v815_v36 }
 0x603   : > { %v1240_v38 = vpop.f32.mrf.mxu0 }
 0x604   : > { %821 = vadd.xlane.f32.xlu0 %v1658_v37  ;;  %v824_v39 = vmul.f32 %v1658_v37, %v1658_v37 }
 0x606   : > { %825 = vadd.xlane.f32.xlu1 %v824_v39 }
 0x68d   : > { %v822_v57 = vpop.xlane.xlu0 %821 }
 0x68e   : > { %v823_v58 = vmul.f32 0.020833334, %v822_v57 }
 0x68f   : > { %v826_v59 = vpop.xlane.xlu1 %825 }
 0x690   : > { %v828_v60 = vmul.f32 %v823_v58, %v823_v58  ;;  %v827_v61 = vmul.f32 0.020833334, %v826_v59  ;;  %v831_v1 = vsub.f32 %v1658_v37, %v823_v58 }
 0x692   : > { %v829_v49 = vsub.f32 %v827_v61, %v828_v60 }
 0x694   : > { %v830_v62 = vmax.f32 %v829_v49, 0.0 }
 0x696   : > { %v832_v63 = vadd.f32 1e-05, %v830_v62 }
 0x698   : > { %1329 = vrsqrt.f32 %v832_v63 }
 0x6a5   : > { %v1330_v3 = vpop.eup %1329 }
 0x6a6   : > { %v834_v5 = vmul.f32 %v1330_v3, %v831_v1 }
 0x6a8   : > { %v839_v6 = vmul.f32 %v1047_v4, %v834_v5 }
 0x6aa   : > { %v844_v7 = vadd.f32 %v1048_v0, %v839_v6 }
 0x6ac   : > { %v845_v8 = vadd.f32 %v844_v7, %v1632_v2 }
 0x6ae   : > { %1274 = vmatmul.mubr.f32.vlgmr.msra.gmra.mxu1 %v845_v8 }
 0x76e   : > { %v934_v10 = vpop.f32.mrf.mxu1 }
 0x76f   : > { %v935_v11 = vadd.f32 %v1049_v9, %v934_v10 }
 0x770   : > { %v1275_v12 = vpop.f32.mrf.mxu1 }
 0x771   : > { %938 = vst [vmem:[%s263_s28] sm:$0xff] %v935_v11 }
 0x772 PF: > { %s17_s18 = sadd.s32 1, %s1423_s18  }
 0x773   : > { %p14_p2 = scmp.ge.s32.totalorder %s17_s18, 4  }
 0x775   :  { %16 = sbr.rel (!%p14_p2) target bundleno = 2 (0x2), region = 86 }
 0x77a   :  { %958 = vsyncpa [#allocation3], 1 }
 0x77b   :  { %960 = vsyncpa [#allocation3 + $0x1], 1 }
 0x77c   :  { %961 = vsyncpa [#allocation5], 1 }

</bundles_post_ra>
